<compile_context>
chip_gen: v6e
topology: v6e:2x2x1
jax: 0.10.0
libtpu: 0.0.40
codegen_flags: <defaults>
</compile_context>

<pallas_src>
import functools

import jax
import jax.numpy as jnp
from jax.experimental import pallas as pl
from jax.experimental.pallas import tpu as pltpu


def adaint_kernel(dp, cd, x_ref, w_ref, b_ref, m_ref, out_ref):
    # x_ref:   (TB, F)           float32
    # w_ref:   (F, C*D1)         float32   (D1 = n_vertices - 1)
    # b_ref:   (1, C*D1)         float32
    # m_ref:   (C*D1, 2*DP)      float32   fused [cumsum+pad | segment-sum] matrix
    # out_ref: (TB, C*D)         float32   (D = n_vertices), lane-dense slab
    logits = (
        jnp.dot(x_ref[...], w_ref[...], preferred_element_type=jnp.float32)
        + b_ref[...]
    )

    # Global per-row max: softmax is shift-invariant, so subtracting one
    # constant per row is mathematically exact for every per-color segment
    # (only differs numerically if cross-color logit gaps exceed ~80).
    m = jnp.max(logits, axis=-1, keepdims=True)
    e = jnp.exp(logits - m)

    # One block-diagonal MXU matmul produces both the fused
    # (cumsum + leading-zero pad) numerators and the per-segment denominators.
    nd = jnp.dot(e, m_ref[...], preferred_element_type=jnp.float32)  # (TB, 2*DP)
    num = nd[:, :dp]          # vreg-aligned split (DP is a multiple of 128)
    den = nd[:, dp:]

    v = num * pl.reciprocal(den, approx=False)                        # (TB, DP)
    out_ref[...] = v[:, :cd].astype(out_ref.dtype)


def adaint_forward(x, weight, bias, n_colors, n_vertices, adaint_share=False,
                   block_b=512):
    """x: (B, F); weight: (out_features, F); bias: (out_features,) [nn.Linear layout].

    out_features = (n_vertices - 1) * (1 if adaint_share else n_colors).
    Returns (B, n_colors, n_vertices), matching the PyTorch module.
    """
    b, f = x.shape
    d1 = n_vertices - 1
    d = n_vertices
    c = n_colors
    cd = c * d
    dp = ((cd + 127) // 128) * 128   # lane-aligned half width of the fused matrix

    if adaint_share:
        # repeat_interleave over the color dim of intervals == reusing the same
        # (d1, f) weight block for every color (column order stays color-major).
        w = jnp.tile(weight, (c, 1))            # (c*d1, f)
        bb = jnp.tile(bias, (c,))               # (c*d1,)
    else:
        # row o of the Linear maps to (color = o // d1, interval = o % d1),
        # which is exactly the packed column order we want.
        w = weight
        bb = bias

    w_packed = jnp.transpose(w).astype(jnp.float32)          # (f, c*d1)
    b_packed = bb.reshape(1, c * d1).astype(jnp.float32)     # (1, c*d1)

    # Fused constant matrix, built once outside the kernel:
    #   left half (cols [0, dp)):  block-diag cumsum-with-leading-zero
    #   right half (cols [dp, 2dp)): block-diag all-ones (softmax denominator),
    #   with den pad columns set to 1 so reciprocal never divides by zero.
    blk_cs = (jnp.arange(d1)[:, None] < jnp.arange(d)[None, :]).astype(jnp.float32)
    eye_c = jnp.eye(c, dtype=jnp.float32)
    m_csum = jnp.kron(eye_c, blk_cs)                                   # (c*d1, cd)
    m_ones = jnp.kron(eye_c, jnp.ones((d1, d), dtype=jnp.float32))     # (c*d1, cd)
    m_num = jnp.zeros((c * d1, dp), jnp.float32).at[:, :cd].set(m_csum)
    m_den = jnp.ones((c * d1, dp), jnp.float32).at[:, :cd].set(m_ones)
    m_fused = jnp.concatenate([m_num, m_den], axis=1)                  # (c*d1, 2*dp)

    x = x.astype(jnp.float32)

    tb = min(b, block_b)
    grid = (pl.cdiv(b, tb),)

    kernel = functools.partial(adaint_kernel, dp, cd)

    out_flat = pl.pallas_call(
        kernel,
        out_shape=jax.ShapeDtypeStruct((b, cd), jnp.float32),
        grid=grid,
        in_specs=[
            pl.BlockSpec((tb, f), lambda i: (i, 0)),
            pl.BlockSpec((f, c * d1), lambda i: (0, 0)),
            pl.BlockSpec((1, c * d1), lambda i: (0, 0)),
            pl.BlockSpec((c * d1, 2 * dp), lambda i: (0, 0)),
        ],
        out_specs=pl.BlockSpec((tb, cd), lambda i: (i, 0)),
        compiler_params=pltpu.CompilerParams(
            dimension_semantics=("parallel",)),
    )(x, w_packed, b_packed, m_fused)

    return out_flat.reshape(b, c, d)


def adaint_reference(x, weight, bias, n_colors, n_vertices, adaint_share=False):
    """Pure-JAX reference mirroring the PyTorch forward exactly."""
    b = x.shape[0]
    y = x @ weight.T + bias
    intervals = y.reshape(b, -1, n_vertices - 1)
    if adaint_share:
        intervals = jnp.repeat(intervals, n_colors, axis=1)
    intervals = jax.nn.softmax(intervals, axis=-1)
    vertices = jnp.pad(jnp.cumsum(intervals, axis=-1), ((0, 0), (0, 0), (1, 0)))
    return vertices


if __name__ == "__main__":
    # Small, module-consistent shapes.
    B = 2            # batch
    N_FEATS = 32     # f: image representation dim
    N_COLORS = 3     # c
    N_VERTICES = 17  # d (so intervals dim = 16)

    key = jax.random.PRNGKey(0)
    kx, kw, kb, kw2, kb2 = jax.random.split(key, 5)
    x = jax.random.normal(kx, (B, N_FEATS), dtype=jnp.float32)

    # --- non-shared AdaInt ---
    OUT_FEATS = (N_VERTICES - 1) * N_COLORS
    # NOTE: the module's init_weights() uses zeros(weight)/ones(bias); we use
    # small deterministic random params so softmax/cumsum is non-trivial.
    weight = 0.05 * jax.random.normal(kw, (OUT_FEATS, N_FEATS), dtype=jnp.float32)
    bias = 0.05 * jax.random.normal(kb, (OUT_FEATS,), dtype=jnp.float32)

    out = adaint_forward(x, weight, bias, N_COLORS, N_VERTICES, adaint_share=False)
    out = jax.block_until_ready(out)
    ref = adaint_reference(x, weight, bias, N_COLORS, N_VERTICES, adaint_share=False)
    assert out.shape == (B, N_COLORS, N_VERTICES), out.shape
    assert jnp.allclose(out, ref, rtol=1e-5, atol=1e-5), float(jnp.max(jnp.abs(out - ref)))

    # --- Share-AdaInt ---
    OUT_FEATS_S = N_VERTICES - 1
    weight_s = 0.05 * jax.random.normal(kw2, (OUT_FEATS_S, N_FEATS), dtype=jnp.float32)
    bias_s = 0.05 * jax.random.normal(kb2, (OUT_FEATS_S,), dtype=jnp.float32)

    out_s = adaint_forward(x, weight_s, bias_s, N_COLORS, N_VERTICES, adaint_share=True)
    out_s = jax.block_until_ready(out_s)
    ref_s = adaint_reference(x, weight_s, bias_s, N_COLORS, N_VERTICES, adaint_share=True)
    assert out_s.shape == (B, N_COLORS, N_VERTICES), out_s.shape
    assert jnp.allclose(out_s, ref_s, rtol=1e-5, atol=1e-5), float(jnp.max(jnp.abs(out_s - ref_s)))

    print("KERNEL_OK")
</pallas_src>

<mosaic_0001>
module attributes {stable_mosaic.version = 11 : i64} {
  func.func @adaint_kernel(%arg0: i32, %arg1: memref<2x32xf32, #tpu.memory_space<vmem>>, %arg2: memref<32x48xf32, #tpu.memory_space<vmem>>, %arg3: memref<1x48xf32, #tpu.memory_space<vmem>>, %arg4: memref<48x256xf32, #tpu.memory_space<vmem>>, %arg5: memref<2x51xf32, #tpu.memory_space<vmem>>) attributes {dimension_semantics = [#tpu.dimension_semantics<parallel>], iteration_bounds = array<i64: 1>, scalar_prefetch = 0 : i64, scratch_operands = 0 : i64, tpu.core_type = #tpu.core_type<tc>, window_params = [{transform_indices = @transform_0, window_bounds = array<i64: 2, 32>}, {pipeline_mode = #tpu.pipeline_mode<synchronous>, transform_indices = @transform_1, window_bounds = array<i64: 32, 48>}, {pipeline_mode = #tpu.pipeline_mode<synchronous>, transform_indices = @transform_2, window_bounds = array<i64: 1, 48>}, {pipeline_mode = #tpu.pipeline_mode<synchronous>, transform_indices = @transform_3, window_bounds = array<i64: 48, 256>}, {transform_indices = @transform_4, window_bounds = array<i64: 2, 51>}]} {
    %c0 = arith.constant 0 : index
    %c0_0 = arith.constant 0 : index
    %0 = vector.load %arg1[%c0, %c0_0] : memref<2x32xf32, #tpu.memory_space<vmem>>, vector<2x32xf32>
    %c0_1 = arith.constant 0 : index
    %c0_2 = arith.constant 0 : index
    %1 = vector.load %arg2[%c0_1, %c0_2] : memref<32x48xf32, #tpu.memory_space<vmem>>, vector<32x48xf32>
    %cst = arith.constant dense<0.000000e+00> : vector<2x48xf32>
    %2 = tpu.matmul %0, %1, %cst {dimension_numbers = #tpu.dot_dimension_numbers<[1], [0], [0], [1], [0, 0, 1, 1], [], []>} : vector<2x32xf32>, vector<32x48xf32>, vector<2x48xf32> -> vector<2x48xf32>
    %c0_3 = arith.constant 0 : index
    %c0_4 = arith.constant 0 : index
    %3 = vector.load %arg3[%c0_3, %c0_4] : memref<1x48xf32, #tpu.memory_space<vmem>>, vector<1x48xf32>
    %4 = vector.broadcast %3 : vector<1x48xf32> to vector<2x48xf32>
    %5 = arith.addf %2, %4 : vector<2x48xf32>
    %cst_5 = arith.constant dense<0xFF800000> : vector<2xf32>
    %6 = vector.multi_reduction <maximumf>, %5, %cst_5 [1] : vector<2x48xf32> to vector<2xf32>
    %7 = vector.shape_cast %6 : vector<2xf32> to vector<2x1xf32>
    %8 = vector.broadcast %7 : vector<2x1xf32> to vector<2x48xf32>
    %9 = arith.subf %5, %8 : vector<2x48xf32>
    %10 = math.exp %9 : vector<2x48xf32>
    %c0_6 = arith.constant 0 : index
    %c0_7 = arith.constant 0 : index
    %11 = vector.load %arg4[%c0_6, %c0_7] : memref<48x256xf32, #tpu.memory_space<vmem>>, vector<48x256xf32>
    %cst_8 = arith.constant dense<0.000000e+00> : vector<2x256xf32>
    %12 = tpu.matmul %10, %11, %cst_8 {dimension_numbers = #tpu.dot_dimension_numbers<[1], [0], [0], [1], [0, 0, 1, 1], [], []>} : vector<2x48xf32>, vector<48x256xf32>, vector<2x256xf32> -> vector<2x256xf32>
    %13 = vector.extract_strided_slice %12 {offsets = [0, 0], sizes = [2, 128], strides = [1, 1]} : vector<2x256xf32> to vector<2x128xf32>
    %14 = vector.extract_strided_slice %12 {offsets = [0, 128], sizes = [2, 128], strides = [1, 1]} : vector<2x256xf32> to vector<2x128xf32>
    %15 = tpu.reciprocal %14 : vector<2x128xf32> -> vector<2x128xf32>
    %16 = arith.mulf %13, %15 : vector<2x128xf32>
    %17 = vector.extract_strided_slice %16 {offsets = [0, 0], sizes = [2, 51], strides = [1, 1]} : vector<2x128xf32> to vector<2x51xf32>
    %c0_9 = arith.constant 0 : index
    %c0_10 = arith.constant 0 : index
    %18 = vector.load %arg5[%c0_9, %c0_10] : memref<2x51xf32, #tpu.memory_space<vmem>>, vector<2x51xf32>
    tpu.vector_store %arg5[%c0_9, %c0_10], %17 {strides = array<i32>} : memref<2x51xf32, #tpu.memory_space<vmem>>, vector<2x51xf32>,
    return
  }
  func.func @transform_0(%arg0: i32) -> (i32, i32) {
    %c0_i32 = arith.constant 0 : i32
    %c0_i32_0 = arith.constant 0 : i32
    return %arg0, %c0_i32 : i32, i32
  }
  func.func @transform_1(%arg0: i32) -> (i32, i32) {
    %c0_i32 = arith.constant 0 : i32
    %c0_i32_0 = arith.constant 0 : i32
    %c0_i32_1 = arith.constant 0 : i32
    return %c0_i32, %c0_i32_0 : i32, i32
  }
  func.func @transform_2(%arg0: i32) -> (i32, i32) {
    %c0_i32 = arith.constant 0 : i32
    %c0_i32_0 = arith.constant 0 : i32
    %c0_i32_1 = arith.constant 0 : i32
    return %c0_i32, %c0_i32_0 : i32, i32
  }
  func.func @transform_3(%arg0: i32) -> (i32, i32) {
    %c0_i32 = arith.constant 0 : i32
    %c0_i32_0 = arith.constant 0 : i32
    %c0_i32_1 = arith.constant 0 : i32
    return %c0_i32, %c0_i32_0 : i32, i32
  }
  func.func @transform_4(%arg0: i32) -> (i32, i32) {
    %c0_i32 = arith.constant 0 : i32
    %c0_i32_0 = arith.constant 0 : i32
    return %arg0, %c0_i32 : i32, i32
  }
}

</mosaic_0001>

<bundles_post_ra>
// kernel: tpu_custom_call.1
= control target key start
LH: loop header
LB: loop body
LE: loop exit
PB: predicated region body
PF: predicated region fallthrough
CT: control target
= control target key end

     0   :  { %9 = vsyncpa [#allocation3], 0  ;;  %s426_s0 = inlined_call_operand.hbm [shape: f32[2,32], index: 0, kind: input, shape index: {}]   ;;  %s427_s1 = inlined_call_operand.hbm [shape: f32[32,48], index: 1, kind: input, shape index: {}]   ;;  %s428_s2 = inlined_call_operand.vmem [shape: f32[1,48], index: 2, kind: input, shape index: {}]   ;;  %s429_s3 = inlined_call_operand.hbm [shape: f32[48,256], index: 3, kind: input, shape index: {}]   ;;  %s430_s4 = inlined_call_operand.hbm [shape: f32[2,51], index: 4, kind: output, shape index: {}]  }
   0x1   :  { %10 = vsyncpa [#allocation6], 0 }
   0x2   :  { %11 = vsyncpa [#allocation4], 0  ;;  %s376_s15 = smov [#allocation5]  }
   0x3   :  { %s27_s16 = sshll.u32 %s376_s15, 4  ;;  %s28_s16 = int_to_ptr.vmem [resolvable:$true] %s27_s16 }
   0x4   :  { %s298_s17 = scalar_lea.vmem %s28_s16, 512  ;;  %p303_p1 = scmp.lt.s32.totalorder %s28_s16, %s28_s16 }
   0x5   :  { %p299_p0 = scmp.ne.s32.totalorder %s28_s16, %s298_s17  ;;  %p304_p2 = scmp.lt.s32.totalorder %s298_s17, %s298_s17 }
   0x7   :  { %p305_p3 = por %p304_p2, %p303_p1 }
   0x9   :  { %p306_p4 = pnand %p305_p3, %p299_p0 }
   0xb   :  { %309 = shalt.err (!%p306_p4)
}
   0xc   :  { %s377_s18 = smov 128   ;;  %s378_s19 = smov 8  }
   0xd   :  { %33 = dma.hbm_to_vmem [thread:$0]  %s427_s1, 512, %s28_s16, [#allocation6], %s377_s18, %s377_s18, %s378_s19  }
   0xe   :  { %s379_s22 = smov [#allocation2]   ;;  %s380_s24 = smov [#allocation7]  }
   0xf   :  { %s18_s23 = sshll.u32 %s379_s22, 4  ;;  %s41_s25 = sshll.u32 %s380_s24, 4  ;;  %s19_s23 = int_to_ptr.vmem [resolvable:$true] %s18_s23  ;;  %s42_s25 = int_to_ptr.vmem [resolvable:$true] %s41_s25 }
  0x10   :  { %s318_s26 = scalar_lea.vmem %s19_s23, 32  ;;  %p323_p6 = scmp.lt.s32.totalorder %s19_s23, %s19_s23 }
  0x11   :  { %p319_p5 = scmp.ne.s32.totalorder %s19_s23, %s318_s26  ;;  %p324_p7 = scmp.lt.s32.totalorder %s318_s26, %s318_s26 }
  0x13   :  { %p325_p8 = por %p324_p7, %p323_p6 }
  0x15   :  { %p326_p9 = pnand %p325_p8, %p319_p5 }
  0x17   :  { %329 = shalt.err (!%p326_p9)
}
  0x18   :  { %21 = dma.hbm_to_vmem [thread:$0]  %s426_s0, 32, %s19_s23, [#allocation3]  }
  0x19   :  { %s338_s29 = scalar_lea.vmem %s42_s25, 1536  ;;  %p343_p11 = scmp.lt.s32.totalorder %s42_s25, %s42_s25 }
  0x1a   :  { %p339_p10 = scmp.ne.s32.totalorder %s42_s25, %s338_s29  ;;  %p344_p12 = scmp.lt.s32.totalorder %s338_s29, %s338_s29 }
  0x1c   :  { %p345_p13 = por %p344_p12, %p343_p11 }
  0x1e   :  { %p346_p0 = pnand %p345_p13, %p339_p10 }
  0x20   :  { %349 = shalt.err (!%p346_p0)
}
  0x21   :  { %s381_s1 = smov 256   ;;  %s382_s30 = smov 16  }
  0x22   :  { %47 = dma.hbm_to_vmem [thread:$0]  %s429_s3, 1536, %s42_s25, [#allocation6], %s381_s1, %s381_s1, %s382_s30  }
  0x23   :  { %370 = dma.done.wait [#allocation3], 32  }
  0x24   :  { %371 = vsyncadd [#allocation3], 4294967264 }
  0x25   :  { %372 = dma.done.wait [#allocation6], 2048  }
  0x26   :  { %373 = vsyncadd [#allocation6], 4294965248  ;;  %v383_v0 = vmov 0.0   ;;  %vm384_vm0 = vmmov 0   ;;  %v61_v1 = vld [vmem:[#allocation5 + $0x18] sm:$0xff]  ;;  %v60_v2 = vld [vmem:[#allocation5 + $0x10] sm:$0xff] }
  0x27   :  { %265 = vmatprep.subr.mxu0 %v383_v0  ;;  %273 = vmatprep.mubr.msk.f32.mxu0 %vm384_vm0, %v383_v0  ;;  %v59_v3 = vld [vmem:[#allocation5 + $0x8] sm:$0xff]  ;;  %v58_v4 = vld [vmem:[#allocation5] sm:$0xff]  ;;  %v57_v5 = vld [vmem:[#allocation2] sm:$0x3]  ;;  %vm69_vm1 = vcmask 261120   ;;  %vm143_vm2 = vcmask 386048  }
  0x28   :  { %230 = vmatprep.mubr.f32.mxu1 %v383_v0  ;;  %266 = vmatpush3.msra.mxu0 %v61_v1  ;;  %v257_v6 = vld [vmem:[%s428_s2] ss:$0 sm:$0xff]  ;;  %v160_v12 = vld [vmem:[#allocation7 + $0x50] sm:$0xff]  ;;  %v159_v13 = vld [vmem:[#allocation7 + $0x48] sm:$0xff]  ;;  %vm162_vm3 = vcmask 392192   ;;  %s385_s2 = smov [#allocation8]  }
  0x29   :  { %267 = vmatprep.subr.mxu0 %v383_v0  ;;  %v161_v11 = vld [vmem:[#allocation7 + $0x58] sm:$0xff]  ;;  %v158_v14 = vld [vmem:[#allocation7 + $0x40] sm:$0xff]  ;;  %v156_v16 = vld [vmem:[#allocation7 + $0x30] sm:$0xff]  ;;  %s247_s7 = sshll.u32 %s385_s2, 4  ;;  %vm239_vm4 = vcmask 410624   ;;  %s248_s7 = int_to_ptr.vmem [resolvable:$true] %s247_s7 }
  0x2a   :  { %268 = vmatpush3.msra.mxu0 %v60_v2  ;;  %186 = vmatprep.subr.mxu1 %v161_v11  ;;  %v157_v15 = vld [vmem:[#allocation7 + $0x38] sm:$0xff]  ;;  %v155_v17 = vld [vmem:[#allocation7 + $0x28] sm:$0xff]  ;;  %v154_v18 = vld [vmem:[#allocation7 + $0x20] sm:$0xff]  ;;  %s350_s8 = scalar_lea.vmem %s248_s7, 32  ;;  %p355_p2 = scmp.lt.s32.totalorder %s248_s7, %s248_s7 }
  0x2b   :  { %269 = vmatprep.subr.mxu0 %v383_v0  ;;  %187 = vmatpush1.msra.mxu1 %v160_v12  ;;  %v153_v19 = vld [vmem:[#allocation7 + $0x18] sm:$0xff]  ;;  %v152_v20 = vld [vmem:[#allocation7 + $0x10] sm:$0xff]  ;;  %v151_v21 = vld [vmem:[#allocation7 + $0x8] sm:$0xff]  ;;  %p351_p1 = scmp.ne.s32.totalorder %s248_s7, %s350_s8  ;;  %p356_p3 = scmp.lt.s32.totalorder %s350_s8, %s350_s8 }
  0x2c   :  { %270 = vmatpush3.msra.mxu0 %v59_v3  ;;  %188 = vmatprep.subr.mxu1 %v159_v13  ;;  %v150_v22 = vld [vmem:[#allocation7] sm:$0xff] }
  0x2d   :  { %271 = vmatprep.subr.mxu0 %v383_v0  ;;  %189 = vmatpush1.msra.mxu1 %v158_v14  ;;  %p357_p4 = por %p356_p3, %p355_p2 }
  0x2e   :  { %272 = vmatpush3.msra.mxu0 %v58_v4  ;;  %190 = vmatprep.subr.mxu1 %v157_v15 }
  0x2f   :  { %274 = vmatmul.mubr.msk.f32.vlgmr.msra.gmra.mxu0 %vm69_vm1, %v57_v5  ;;  %191 = vmatpush1.msra.mxu1 %v156_v16  ;;  %p358_p5 = pnand %p357_p4, %p351_p1 }
  0x30   :  { %192 = vmatprep.subr.mxu1 %v155_v17 }
  0x31   :  { %193 = vmatpush1.msra.mxu1 %v154_v18 }
  0x32   :  { %194 = vmatprep.subr.mxu1 %v153_v19 }
  0x33   :  { %195 = vmatpush1.msra.mxu1 %v152_v20 }
  0x34   :  { %196 = vmatprep.subr.mxu1 %v151_v21 }
  0x35   :  { %197 = vmatpush1.msra.mxu1 %v150_v22 }
  0xef   :  { %v139_v7 = vpop.f32.mrf.mxu0 }
  0xf0   :  { %v140_v8 = vadd.f32 %v257_v6, %v139_v7 }
  0xf1   :  { %v275_v9 = vpop.f32.mrf.mxu0 }
  0xf2   :  { %v144_v10 = vsel %vm143_vm2, %v140_v8, -inf }
  0xf3   :  { %145 = vmax.xlane.f32.xlu0 %v144_v10 }
 0x17c   :  { %v146_v23 = vpop.xlane.xlu0 %145 }
 0x17d   :  { %v147_v24 = vsub.f32 %v140_v8, %v146_v23 }
 0x17f   :  { %v148_v25 = vmul.f32 1.442695, %v147_v24 }
 0x181   :  { %286 = vpow2.f32 %v148_v25 }
 0x18e   :  { %v287_v26 = vpop.eup %286 }
 0x18f   :  { %259 = vmatmul.mubr.msk.f32.vlgmr.msra.gmra.mxu1 %vm162_vm3, %v287_v26 }
 0x24f   :  { %v232_v27 = vpop.f32.mrf.mxu1 }
 0x251   :  { %v234_v28 = vpop.f32.mrf.mxu1 }
 0x252   :  { %288 = vrcp.f32 %v234_v28 }
 0x25f   :  { %v289_v29 = vpop.eup %288 }
 0x260   :  { %v238_v30 = vmul.f32 %v289_v29, %v232_v27 }
 0x262   :  { %240 = vst.msk [vmem:[#allocation8] sm:$0x3] %vm239_vm4, %v238_v30 }
 0x263   :  { %361 = shalt.err (!%p358_p5)
}
 0x264   :  { %250 = dma.vmem_to_hbm [thread:$0]  %s248_s7, 32, %s430_s4, [#allocation4]  }
 0x265   :  { %374 = dma.done.wait [#allocation4], 32  }
 0x266   :  { %375 = vsyncadd [#allocation4], 4294967264 }
 0x267   :  { %254 = vsyncpa [#allocation3], 1 }
 0x268   :  { %255 = vsyncpa [#allocation6], 1 }
 0x269   :  { %256 = vsyncpa [#allocation4], 1 }

</bundles_post_ra>
